<compile_context>
chip_gen: v5e
topology: v5e:2x2
jax: 0.10.0
libtpu: 0.0.40
codegen_flags: <defaults>
</compile_context>

<pallas_src>
import functools
import math

import jax
import jax.numpy as jnp
from jax.experimental import pallas as pl
from jax.experimental.pallas import tpu as pltpu


def _embedding_gather_kernel(ids_ref, w_hbm, out_ref, row_buf, sems,
                             *, vocab, scale, token_block, nbuf):
    """Gather `token_block` embedding rows from HBM per grid step.

    ids_ref : (N_pad,) int32 in SMEM (scalar-prefetched token ids)
    w_hbm   : (vocab, d_model) f32, left in HBM (memory_space=pl.ANY)
    out_ref : (token_block, d_model) f32 VMEM output block
    row_buf : (nbuf, 1, d_model) f32 VMEM DMA landing buffers
    sems    : (nbuf,) DMA semaphores
    """
    blk = pl.program_id(0)
    base = blk * token_block

    def start_fetch(t, slot):
        # Clamp out-of-range ids (PyTorch nn.Embedding would raise instead).
        tok = jnp.clip(ids_ref[base + t], 0, vocab - 1)
        pltpu.make_async_copy(
            w_hbm.at[pl.ds(tok, 1), :], row_buf.at[slot], sems.at[slot]
        ).start()

    def wait_fetch(slot):
        # src only provides the transfer shape for the wait.
        pltpu.make_async_copy(
            w_hbm.at[pl.ds(0, 1), :], row_buf.at[slot], sems.at[slot]
        ).wait()

    # Prime up to `nbuf` row copies.
    n_prime = min(nbuf, token_block)
    for t in range(n_prime):  # static, tiny
        start_fetch(t, t)

    @pl.loop(0, token_block)
    def _(t):
        slot = t % nbuf
        wait_fetch(slot)
        # Fused sqrt(d_model) scaling on the gathered row.
        out_ref[pl.ds(t, 1), :] = row_buf[slot] * scale
        nxt = t + n_prime
        @pl.when(nxt < token_block)
        def _():
            start_fetch(nxt, slot)


def embeddings_forward(token_ids, weight, *, token_block=256, nbuf=4):
    """token_ids: (B, S) int -> (B, S, d_model) f32 == Embedding(x) * sqrt(d_model)."""
    B, S = token_ids.shape
    vocab, d_model = weight.shape
    N = B * S

    n_blocks = pl.cdiv(N, token_block)
    n_pad = n_blocks * token_block

    ids_flat = token_ids.reshape(N).astype(jnp.int32)
    if n_pad != N:
        # Padded ids gather row 0; the rows are sliced off below.
        ids_flat = jnp.pad(ids_flat, (0, n_pad - N))

    scale = float(math.sqrt(d_model))

    kernel = functools.partial(
        _embedding_gather_kernel,
        vocab=vocab, scale=scale, token_block=token_block, nbuf=nbuf,
    )

    out_flat = pl.pallas_call(
        kernel,
        out_shape=jax.ShapeDtypeStruct((n_pad, d_model), jnp.float32),
        grid_spec=pltpu.PrefetchScalarGridSpec(
            num_scalar_prefetch=1,          # ids -> SMEM
            grid=(n_blocks,),
            in_specs=[
                pl.BlockSpec(memory_space=pl.ANY),   # table stays in HBM
            ],
            out_specs=pl.BlockSpec((token_block, d_model), lambda i, ids: (i, 0)),
            scratch_shapes=[
                pltpu.VMEM((nbuf, 1, d_model), jnp.float32),
                pltpu.SemaphoreType.DMA((nbuf,)),
            ],
        ),
        compiler_params=pltpu.CompilerParams(
            dimension_semantics=("arbitrary",),
        ),
    )(ids_flat, weight.astype(jnp.float32))

    return out_flat[:N].reshape(B, S, d_model)


if __name__ == "__main__":
    key = jax.random.PRNGKey(0)
    k_ids, k_w = jax.random.split(key)

    # Small shapes: batch=2, seq=7 (exercises padding), vocab=512, d_model=128
    # (lane-dense stores). token_block=8 -> 2 grid steps, nbuf=4 DMAs in flight.
    B, S, vocab, d_model = 2, 7, 512, 128

    token_ids = jax.random.randint(k_ids, (B, S), 0, vocab, dtype=jnp.int32)
    # Deterministic "learnable" embedding table (nn.Embedding default ~ N(0,1)).
    lut_weight = jax.random.normal(k_w, (vocab, d_model), dtype=jnp.float32)

    out = embeddings_forward(token_ids, lut_weight, token_block=8, nbuf=4)
    out = jax.block_until_ready(out)

    # Reference check against plain-JAX gather semantics.
    ref = lut_weight[token_ids] * math.sqrt(d_model)
    assert out.shape == (B, S, d_model)
    assert jnp.allclose(out, ref, atol=1e-5, rtol=1e-5), "mismatch vs reference"

    # TODO(synk): backward (learnable-weight gradient scatter-add) is not part of
    # this forward kernel.
    print("KERNEL_OK")
</pallas_src>

<mosaic_0001>
module attributes {stable_mosaic.version = 11 : i64} {
  func.func @_embedding_gather_kernel(%arg0: i32, %arg1: memref<16xi32, #tpu.memory_space<smem>>, %arg2: memref<512x128xf32, #tpu.memory_space<any>>, %arg3: memref<8x128xf32, #tpu.memory_space<vmem>>, %arg4: memref<4x1x128xf32, #tpu.memory_space<vmem>>, %arg5: memref<4x!tpu.dma_semaphore, #tpu.memory_space<semaphore_mem>>) attributes {dimension_semantics = [#tpu.dimension_semantics<arbitrary>], iteration_bounds = array<i64: 2>, scalar_prefetch = 1 : i64, scratch_operands = 2 : i64, tpu.core_type = #tpu.core_type<tc>, window_params = [{}, {transform_indices = @transform_1, window_bounds = array<i64: 8, 128>}]} {
    %c8_i32 = arith.constant 8 : i32
    %0 = arith.muli %arg0, %c8_i32 : i32
    %c0_i32 = arith.constant 0 : i32
    %1 = arith.addi %0, %c0_i32 : i32
    %2 = arith.index_cast %1 : i32 to index
    %3 = memref.load %arg1[%2] : memref<16xi32, #tpu.memory_space<smem>>
    %c0_i32_0 = arith.constant 0 : i32
    %c511_i32 = arith.constant 511 : i32
    %4 = arith.maxsi %c0_i32_0, %3 : i32
    %5 = arith.minsi %c511_i32, %4 : i32
    %c0_i32_1 = arith.constant 0 : i32
    %c0_i32_2 = arith.constant 0 : i32
    %c0_i32_3 = arith.constant 0 : i32
    %6 = tpu.memref_slice %arg2[%5, %c0_i32_3] : memref<512x128xf32, #tpu.memory_space<any>> -> memref<1x128xf32, #tpu.memory_space<any>>
    %c0_i32_4 = arith.constant 0 : i32
    %c0_i32_5 = arith.constant 0 : i32
    %7 = tpu.memref_slice %arg4[%c0_i32_1, %c0_i32_4, %c0_i32_5] : memref<4x1x128xf32, #tpu.memory_space<vmem>> -> memref<1x1x128xf32, #tpu.memory_space<vmem>>
    %8 = tpu.memref_squeeze %7 : memref<1x1x128xf32, #tpu.memory_space<vmem>> -> memref<1x128xf32, #tpu.memory_space<vmem>>
    %9 = tpu.memref_slice %arg5[%c0_i32_2] : memref<4x!tpu.dma_semaphore, #tpu.memory_space<semaphore_mem>> -> memref<1x!tpu.dma_semaphore, #tpu.memory_space<semaphore_mem>>
    %10 = tpu.memref_squeeze %9 : memref<1x!tpu.dma_semaphore, #tpu.memory_space<semaphore_mem>> -> memref<!tpu.dma_semaphore, #tpu.memory_space<semaphore_mem>>
    tpu.enqueue_dma source(%6 : memref<1x128xf32, #tpu.memory_space<any>>) target(%8 : memref<1x128xf32, #tpu.memory_space<vmem>>) target_semaphore(%10 : memref<!tpu.dma_semaphore, #tpu.memory_space<semaphore_mem>>)
    %c1_i32 = arith.constant 1 : i32
    %11 = arith.addi %0, %c1_i32 : i32
    %12 = arith.index_cast %11 : i32 to index
    %13 = memref.load %arg1[%12] : memref<16xi32, #tpu.memory_space<smem>>
    %c0_i32_6 = arith.constant 0 : i32
    %c511_i32_7 = arith.constant 511 : i32
    %14 = arith.maxsi %c0_i32_6, %13 : i32
    %15 = arith.minsi %c511_i32_7, %14 : i32
    %c1_i32_8 = arith.constant 1 : i32
    %c1_i32_9 = arith.constant 1 : i32
    %c0_i32_10 = arith.constant 0 : i32
    %16 = tpu.memref_slice %arg2[%15, %c0_i32_10] : memref<512x128xf32, #tpu.memory_space<any>> -> memref<1x128xf32, #tpu.memory_space<any>>
    %c0_i32_11 = arith.constant 0 : i32
    %c0_i32_12 = arith.constant 0 : i32
    %17 = tpu.memref_slice %arg4[%c1_i32_8, %c0_i32_11, %c0_i32_12] : memref<4x1x128xf32, #tpu.memory_space<vmem>> -> memref<1x1x128xf32, #tpu.memory_space<vmem>>
    %18 = tpu.memref_squeeze %17 : memref<1x1x128xf32, #tpu.memory_space<vmem>> -> memref<1x128xf32, #tpu.memory_space<vmem>>
    %19 = tpu.memref_slice %arg5[%c1_i32_9] : memref<4x!tpu.dma_semaphore, #tpu.memory_space<semaphore_mem>> -> memref<1x!tpu.dma_semaphore, #tpu.memory_space<semaphore_mem>>
    %20 = tpu.memref_squeeze %19 : memref<1x!tpu.dma_semaphore, #tpu.memory_space<semaphore_mem>> -> memref<!tpu.dma_semaphore, #tpu.memory_space<semaphore_mem>>
    tpu.enqueue_dma source(%16 : memref<1x128xf32, #tpu.memory_space<any>>) target(%18 : memref<1x128xf32, #tpu.memory_space<vmem>>) target_semaphore(%20 : memref<!tpu.dma_semaphore, #tpu.memory_space<semaphore_mem>>)
    %c2_i32 = arith.constant 2 : i32
    %21 = arith.addi %0, %c2_i32 : i32
    %22 = arith.index_cast %21 : i32 to index
    %23 = memref.load %arg1[%22] : memref<16xi32, #tpu.memory_space<smem>>
    %c0_i32_13 = arith.constant 0 : i32
    %c511_i32_14 = arith.constant 511 : i32
    %24 = arith.maxsi %c0_i32_13, %23 : i32
    %25 = arith.minsi %c511_i32_14, %24 : i32
    %c2_i32_15 = arith.constant 2 : i32
    %c2_i32_16 = arith.constant 2 : i32
    %c0_i32_17 = arith.constant 0 : i32
    %26 = tpu.memref_slice %arg2[%25, %c0_i32_17] : memref<512x128xf32, #tpu.memory_space<any>> -> memref<1x128xf32, #tpu.memory_space<any>>
    %c0_i32_18 = arith.constant 0 : i32
    %c0_i32_19 = arith.constant 0 : i32
    %27 = tpu.memref_slice %arg4[%c2_i32_15, %c0_i32_18, %c0_i32_19] : memref<4x1x128xf32, #tpu.memory_space<vmem>> -> memref<1x1x128xf32, #tpu.memory_space<vmem>>
    %28 = tpu.memref_squeeze %27 : memref<1x1x128xf32, #tpu.memory_space<vmem>> -> memref<1x128xf32, #tpu.memory_space<vmem>>
    %29 = tpu.memref_slice %arg5[%c2_i32_16] : memref<4x!tpu.dma_semaphore, #tpu.memory_space<semaphore_mem>> -> memref<1x!tpu.dma_semaphore, #tpu.memory_space<semaphore_mem>>
    %30 = tpu.memref_squeeze %29 : memref<1x!tpu.dma_semaphore, #tpu.memory_space<semaphore_mem>> -> memref<!tpu.dma_semaphore, #tpu.memory_space<semaphore_mem>>
    tpu.enqueue_dma source(%26 : memref<1x128xf32, #tpu.memory_space<any>>) target(%28 : memref<1x128xf32, #tpu.memory_space<vmem>>) target_semaphore(%30 : memref<!tpu.dma_semaphore, #tpu.memory_space<semaphore_mem>>)
    %c3_i32 = arith.constant 3 : i32
    %31 = arith.addi %0, %c3_i32 : i32
    %32 = arith.index_cast %31 : i32 to index
    %33 = memref.load %arg1[%32] : memref<16xi32, #tpu.memory_space<smem>>
    %c0_i32_20 = arith.constant 0 : i32
    %c511_i32_21 = arith.constant 511 : i32
    %34 = arith.maxsi %c0_i32_20, %33 : i32
    %35 = arith.minsi %c511_i32_21, %34 : i32
    %c3_i32_22 = arith.constant 3 : i32
    %c3_i32_23 = arith.constant 3 : i32
    %c0_i32_24 = arith.constant 0 : i32
    %36 = tpu.memref_slice %arg2[%35, %c0_i32_24] : memref<512x128xf32, #tpu.memory_space<any>> -> memref<1x128xf32, #tpu.memory_space<any>>
    %c0_i32_25 = arith.constant 0 : i32
    %c0_i32_26 = arith.constant 0 : i32
    %37 = tpu.memref_slice %arg4[%c3_i32_22, %c0_i32_25, %c0_i32_26] : memref<4x1x128xf32, #tpu.memory_space<vmem>> -> memref<1x1x128xf32, #tpu.memory_space<vmem>>
    %38 = tpu.memref_squeeze %37 : memref<1x1x128xf32, #tpu.memory_space<vmem>> -> memref<1x128xf32, #tpu.memory_space<vmem>>
    %39 = tpu.memref_slice %arg5[%c3_i32_23] : memref<4x!tpu.dma_semaphore, #tpu.memory_space<semaphore_mem>> -> memref<1x!tpu.dma_semaphore, #tpu.memory_space<semaphore_mem>>
    %40 = tpu.memref_squeeze %39 : memref<1x!tpu.dma_semaphore, #tpu.memory_space<semaphore_mem>> -> memref<!tpu.dma_semaphore, #tpu.memory_space<semaphore_mem>>
    tpu.enqueue_dma source(%36 : memref<1x128xf32, #tpu.memory_space<any>>) target(%38 : memref<1x128xf32, #tpu.memory_space<vmem>>) target_semaphore(%40 : memref<!tpu.dma_semaphore, #tpu.memory_space<semaphore_mem>>)
    %c0_i32_27 = arith.constant 0 : i32
    %c8_i32_28 = arith.constant 8 : i32
    %41 = arith.addi %c0_i32_27, %c8_i32_28 : i32
    %c1_i32_29 = arith.constant 1 : i32
    scf.for %arg6 = %c0_i32_27 to %41 step %c1_i32_29  : i32 {
      %c1_i32_31 = arith.constant 1 : i32
      %42 = arith.muli %arg6, %c1_i32_31 : i32
      %c0_i32_32 = arith.constant 0 : i32
      %43 = arith.addi %c0_i32_32, %42 : i32
      %c4_i32 = arith.constant 4 : i32
      %c0_i32_33 = arith.constant 0 : i32
      %44 = arith.cmpi eq, %c4_i32, %c0_i32_33 : i32
      %c1_i32_34 = arith.constant 1 : i32
      %45 = arith.select %44, %c1_i32_34, %c4_i32 : i32
      %46 = arith.remsi %43, %45 : i32
      %c0_i32_35 = arith.constant 0 : i32
      %47 = arith.cmpi ne, %46, %c0_i32_35 : i32
      %c0_i32_36 = arith.constant 0 : i32
      %48 = arith.cmpi slt, %46, %c0_i32_36 : i32
      %c0_i32_37 = arith.constant 0 : i32
      %49 = arith.cmpi slt, %45, %c0_i32_37 : i32
      %50 = arith.xori %48, %49 : i1
      %51 = arith.andi %50, %47 : i1
      %52 = arith.addi %46, %45 : i32
      %53 = arith.select %51, %52, %46 : i32
      %c0_i32_38 = arith.constant 0 : i32
      %c0_i32_39 = arith.constant 0 : i32
      %54 = tpu.memref_slice %arg2[%c0_i32_38, %c0_i32_39] : memref<512x128xf32, #tpu.memory_space<any>> -> memref<1x128xf32, #tpu.memory_space<any>>
      %c0_i32_40 = arith.constant 0 : i32
      %c0_i32_41 = arith.constant 0 : i32
      %55 = tpu.memref_slice %arg4[%53, %c0_i32_40, %c0_i32_41] : memref<4x1x128xf32, #tpu.memory_space<vmem>> -> memref<1x1x128xf32, #tpu.memory_space<vmem>>
      %56 = tpu.memref_squeeze %55 : memref<1x1x128xf32, #tpu.memory_space<vmem>> -> memref<1x128xf32, #tpu.memory_space<vmem>>
      %57 = tpu.memref_slice %arg5[%53] : memref<4x!tpu.dma_semaphore, #tpu.memory_space<semaphore_mem>> -> memref<1x!tpu.dma_semaphore, #tpu.memory_space<semaphore_mem>>
      %58 = tpu.memref_squeeze %57 : memref<1x!tpu.dma_semaphore, #tpu.memory_space<semaphore_mem>> -> memref<!tpu.dma_semaphore, #tpu.memory_space<semaphore_mem>>
      tpu.wait_dma2 semaphore(%58 : memref<!tpu.dma_semaphore, #tpu.memory_space<semaphore_mem>>) src(%54 : memref<1x128xf32, #tpu.memory_space<any>>) dst(%56 : memref<1x128xf32, #tpu.memory_space<vmem>>)
      %59 = arith.index_cast %53 : i32 to index
      %c0 = arith.constant 0 : index
      %c0_42 = arith.constant 0 : index
      %60 = vector.load %arg4[%59, %c0, %c0_42] : memref<4x1x128xf32, #tpu.memory_space<vmem>>, vector<1x1x128xf32>
      %61 = vector.shape_cast %60 : vector<1x1x128xf32> to vector<1x128xf32>
      %cst = arith.constant 11.3137083 : f32
      %62 = vector.broadcast %cst : f32 to vector<1x128xf32>
      %63 = arith.mulf %61, %62 : vector<1x128xf32>
      %64 = arith.index_cast %43 : i32 to index
      %c0_43 = arith.constant 0 : index
      %65 = vector.load %arg3[%64, %c0_43] : memref<8x128xf32, #tpu.memory_space<vmem>>, vector<1x128xf32>
      tpu.vector_store %arg3[%64, %c0_43], %63 {strides = array<i32>} : memref<8x128xf32, #tpu.memory_space<vmem>>, vector<1x128xf32>,
      %c4_i32_44 = arith.constant 4 : i32
      %66 = arith.addi %43, %c4_i32_44 : i32
      %c8_i32_45 = arith.constant 8 : i32
      %67 = arith.cmpi slt, %66, %c8_i32_45 : i32
      %68 = arith.extui %67 : i1 to i32
      %c0_i32_46 = arith.constant 0 : i32
      %69 = arith.cmpi ne, %68, %c0_i32_46 : i32
      scf.if %69 {
        %70 = arith.addi %0, %66 : i32
        %71 = arith.index_cast %70 : i32 to index
        %72 = memref.load %arg1[%71] : memref<16xi32, #tpu.memory_space<smem>>
        %c0_i32_47 = arith.constant 0 : i32
        %c511_i32_48 = arith.constant 511 : i32
        %73 = arith.maxsi %c0_i32_47, %72 : i32
        %74 = arith.minsi %c511_i32_48, %73 : i32
        %c0_i32_49 = arith.constant 0 : i32
        %75 = tpu.memref_slice %arg2[%74, %c0_i32_49] : memref<512x128xf32, #tpu.memory_space<any>> -> memref<1x128xf32, #tpu.memory_space<any>>
        %c0_i32_50 = arith.constant 0 : i32
        %c0_i32_51 = arith.constant 0 : i32
        %76 = tpu.memref_slice %arg4[%53, %c0_i32_50, %c0_i32_51] : memref<4x1x128xf32, #tpu.memory_space<vmem>> -> memref<1x1x128xf32, #tpu.memory_space<vmem>>
        %77 = tpu.memref_squeeze %76 : memref<1x1x128xf32, #tpu.memory_space<vmem>> -> memref<1x128xf32, #tpu.memory_space<vmem>>
        %78 = tpu.memref_slice %arg5[%53] : memref<4x!tpu.dma_semaphore, #tpu.memory_space<semaphore_mem>> -> memref<1x!tpu.dma_semaphore, #tpu.memory_space<semaphore_mem>>
        %79 = tpu.memref_squeeze %78 : memref<1x!tpu.dma_semaphore, #tpu.memory_space<semaphore_mem>> -> memref<!tpu.dma_semaphore, #tpu.memory_space<semaphore_mem>>
        tpu.enqueue_dma source(%75 : memref<1x128xf32, #tpu.memory_space<any>>) target(%77 : memref<1x128xf32, #tpu.memory_space<vmem>>) target_semaphore(%79 : memref<!tpu.dma_semaphore, #tpu.memory_space<semaphore_mem>>)
      } else {
      }
    }
    %c8_i32_30 = arith.constant 8 : i32
    return
  }
  func.func @transform_1(%arg0: i32, %arg1: memref<16xi32, #tpu.memory_space<smem>>) -> (i32, i32) {
    %c0_i32 = arith.constant 0 : i32
    %c0_i32_0 = arith.constant 0 : i32
    return %arg0, %c0_i32 : i32, i32
  }
}

</mosaic_0001>

<bundles_post_ra>
// kernel: tpu_custom_call.1
= control target key start
LH: loop header
LB: loop body
LE: loop exit
PB: predicated region body
PF: predicated region fallthrough
CT: control target
= control target key end

     0   :  { %s598_s12 = smov [#allocation5]   ;;  %s814_s0 = inlined_call_operand.hbm [shape: s32[16], index: 0, kind: input, shape index: {}]   ;;  %s815_s1 = inlined_call_operand.hbm [shape: f32[512,128], index: 1, kind: input, shape index: {}]   ;;  %s816_s2 = inlined_call_operand.hbm [shape: f32[16,128], index: 2, kind: output, shape index: {}]  }
   0x1   :  { %s8_s11 = sshll.u32 %s814_s0, 4  ;;  %s9_s11 = int_to_ptr.hbm [resolvable:$true] %s8_s11 }
   0x2   :  { %11 = dma.hbm_to_smem %s9_s11, 16, %s598_s12, [#allocation4] }
   0x3   :  { %574 = dma.done.wait [#allocation4], 16 }
   0x4   :  { %575 = vsyncadd [#allocation4], 4294967280 }
   0x5   :  { %14 = sfence }
   0x6   :  { %15 = vsyncpa [#allocation7], 0 }
   0x7   :  { %17 = vsyncpa [#allocation7 + $0x1], 0  ;;  %s622_s13 = smov 0   ;;  %s624_s14 = smov 0  }
   0x8   :  { %s626_s15 = smov 0  }
   0x9 LB: > { %s293_s0 = sadd.s32 4294967295, %s592_s15   ;;  %s639_s16 = sadd.s32 1, %s592_s15   ;;  %s592_s15 = sphi %s626_s15, %s823_s15   ;;  %s588_s14 = sphi %s624_s14, %s822_s14   ;;  %s584_s13 = sphi %s622_s13, %s821_s13  }
   0xa   : > { %s26_s17 = ssub.s32 %s592_s15, %s639_s16  ;;  %s29_s18 = sadd.s32 1, %s588_s14 }
   0xb   : > { %p27_p0 = scmp.eq.s32.totalorder %s26_s17, 0  ;;  %p294_p1 = scmp.ne.s32.totalorder %s26_s17, 0 }
   0xc   : > { %p33_p2 = scmp.eq.s32.totalorder %s592_s15, 1  ;;  %p38_p3 = scmp.ne.s32.totalorder %s588_s14, %s584_s13 }
   0xd   : > { %s648_s19 = scalar_select %p27_p0, %s588_s14, %s29_s18  }
   0xe   : > { %p650_p4 = por %p294_p1, %p33_p2  ;;  %p39_p5 = scmp.eq.s32.totalorder %s293_s0, 1 }
   0xf   : > { %p295_p7 = scmp.ge.s32.totalorder %s592_s15, 2 }
  0x10   : > { %p654_p6 = por %p39_p5, %p38_p3  ;;  %s53_s22 = sand.u32 (!%p295_p7), 1, %s588_s14  }
  0x11   : > { %48 = sbr.rel (%p295_p7) target bundleno = 152 (0x98), region = 12  ;;  %s661_s23 = sshll.u32 (!%p295_p7), %s592_s15, 3 }
  0x12   : > { %s818_s21 = scalar_select %p654_p6, 1, 0 }
  0x13   : > { %s665_s24 = sshll.u32 (!%p295_p7), %s53_s22, 3  ;;  %s57_s25 = sld [smem:[#allocation5 + %s661_s23]] (!%p295_p7) }
  0x14   : > { %s76_s26 = sadd.s32 (!%p295_p7), 1, %s661_s23  ;;  %s599_s27 = smov (!%p295_p7), [#allocation2]  }
  0x15   : > { %s669_s28 = sshll.u32 (!%p295_p7), %s599_s27, 4  ;;  %s671_s29 = sld [smem:[#allocation5 + %s76_s26]] (!%p295_p7)  ;;  %s73_s28 = int_to_ptr.vmem [resolvable:$true] %s669_s28 }
  0x16   : > { %s98_s30 = sadd.s32 2, %s661_s23  ;;  %s600_s3 = smov [#allocation2 + $0x1]  }
  0x17   : > { %s674_s4 = sshll.u32 %s600_s3, 4  ;;  %s676_s5 = sld [smem:[#allocation5 + %s98_s30]]  ;;  %s95_s4 = int_to_ptr.vmem [resolvable:$true] %s674_s4 }
  0x18   : > { %s691_s18 = scalar_lea.hbm %s815_s1, 512 }
  0x19   : > { %p58_p8 = scmp.gt.s32.totalorder %s57_s25, 0  ;;  %p298_p9 = scmp.lt.s32.totalorder %s57_s25, 511 }
  0x1b   : > { %s825_s25 = smov (!%p58_p8, %s57_s25), 0  ;;  %p78_p10 = scmp.gt.s32.totalorder %s671_s29, 0 }
  0x1c   : > { %s827_s25 = smov (!%p298_p9, %s825_s25), 511  ;;  %p303_p11 = scmp.lt.s32.totalorder %s671_s29, 511 }
  0x1d   : > { %s79_s6 = scalar_select %p78_p10, %s671_s29, 0 }
  0x1e   : > { %s62_s9 = scalar_lea.hbm %s815_s1, %s827_s25  ;;  %p100_p12 = scmp.gt.s32.totalorder %s676_s5, 0 }
  0x1f   : > { %s70_s10 = sshll.u32 %s62_s9, 4  ;;  %p308_p13 = scmp.lt.s32.totalorder %s676_s5, 511  ;;  %s71_s10 = int_to_ptr.hbm [resolvable:$true] %s70_s10 }
  0x20   : > { %s406_s11 = sshra.s32 %s71_s10, 4  ;;  %s407_s11 = int_to_ptr.hbm [resolvable:$true] %s406_s11 }
  0x21   : > { %s408_s12 = scalar_lea.hbm %s407_s11, 1  ;;  %p411_p1 = scmp.lt.s32.totalorder %s407_s11, %s815_s1 }
  0x22   : > { %p409_p0 = scmp.ne.s32.totalorder %s407_s11, %s408_s12  ;;  %p412_p2 = scmp.lt.s32.totalorder %s691_s18, %s408_s12 }
  0x24   : > { %p413_p3 = por %p412_p2, %p411_p1 }
  0x26   : > { %p414_p5 = pnand %p413_p3, %p409_p0 }
  0x28   : > { %417 = shalt.err (!%p414_p5)  }
  0x29   : > { %75 = dma.hbm_to_vmem [thread:$0]  %s71_s10, 16, %s73_s28, [#allocation3] }
  0x2a   : > { %s829_s6 = smov (!%p303_p11, %s79_s6), 511  ;;  %s601_s8 = smov [#allocation2 + $0x2]  }
  0x2b   : > { %s101_s25 = scalar_select %p100_p12, %s676_s5, 0 }
  0x2c   : > { %s82_s7 = scalar_lea.hbm %s815_s1, %s829_s6  ;;  %s705_s9 = sshll.u32 %s601_s8, 4  ;;  %s117_s9 = int_to_ptr.vmem [resolvable:$true] %s705_s9 }
  0x2d   : > { %s92_s11 = sshll.u32 %s82_s7, 4  ;;  %s120_s12 = sadd.s32 3, %s661_s23  ;;  %s93_s11 = int_to_ptr.hbm [resolvable:$true] %s92_s11 }
  0x2e   : > { %s708_s28 = sld [smem:[#allocation5 + %s120_s12]]  ;;  %s430_s29 = sshra.s32 %s93_s11, 4  ;;  %s431_s29 = int_to_ptr.hbm [resolvable:$true] %s430_s29 }
  0x2f   : > { %s432_s10 = scalar_lea.hbm %s431_s29, 1  ;;  %p435_p8 = scmp.lt.s32.totalorder %s431_s29, %s815_s1 }
  0x30   : > { %p433_p7 = scmp.ne.s32.totalorder %s431_s29, %s432_s10  ;;  %p436_p9 = scmp.lt.s32.totalorder %s691_s18, %s432_s10 }
  0x32   : > { %p437_p10 = por %p436_p9, %p435_p8 }
  0x34   : > { %p438_p11 = pnand %p437_p10, %p433_p7 }
  0x36   : > { %441 = shalt.err (!%p438_p11)  }
  0x37   : > { %97 = dma.hbm_to_vmem [thread:$0]  %s93_s11, 16, %s95_s4, [#allocation3 + $0x1] }
  0x38   : > { %s831_s25 = smov (!%p308_p13, %s101_s25), 511  ;;  %p122_p12 = scmp.gt.s32.totalorder %s708_s28, 0 }
  0x39   : > { %s104_s27 = scalar_lea.hbm %s815_s1, %s831_s25 }
  0x3a   : > { %s114_s30 = sshll.u32 %s104_s27, 4  ;;  %s115_s30 = int_to_ptr.hbm [resolvable:$true] %s114_s30 }
  0x3b   : > { %s454_s3 = sshra.s32 %s115_s30, 4  ;;  %s455_s3 = int_to_ptr.hbm [resolvable:$true] %s454_s3 }
  0x3c   : > { %s456_s7 = scalar_lea.hbm %s455_s3, 1  ;;  %p459_p1 = scmp.lt.s32.totalorder %s455_s3, %s815_s1 }
  0x3d   : > { %p457_p0 = scmp.ne.s32.totalorder %s455_s3, %s456_s7  ;;  %p460_p2 = scmp.lt.s32.totalorder %s691_s18, %s456_s7 }
  0x3f   : > { %p461_p3 = por %p460_p2, %p459_p1 }
  0x41   : > { %p462_p5 = pnand %p461_p3, %p457_p0 }
  0x43   : > { %465 = shalt.err (!%p462_p5)  }
  0x44   : > { %119 = dma.hbm_to_vmem [thread:$0]  %s115_s30, 16, %s117_s9, [#allocation3 + $0x2] }
  0x45   : > { %s123_s4 = scalar_select %p122_p12, %s708_s28, 0 }
  0x46   : > { %p313_p13 = scmp.lt.s32.totalorder %s708_s28, 511  ;;  %s602_s5 = smov [#allocation2 + $0x3]  }
  0x47   : > { %s138_s25 = sshll.u32 %s602_s5, 4  ;;  %s139_s25 = int_to_ptr.vmem [resolvable:$true] %s138_s25 }
  0x48   : > { %s833_s4 = smov (!%p313_p13, %s123_s4), 511 }
  0x49   : > { %s126_s10 = scalar_lea.hbm %s815_s1, %s833_s4 }
  0x4a   : > { %s136_s0 = sshll.u32 %s126_s10, 4  ;;  %s137_s0 = int_to_ptr.hbm [resolvable:$true] %s136_s0 }
  0x4b   : > { %s478_s17 = sshra.s32 %s137_s0, 4  ;;  %s479_s17 = int_to_ptr.hbm [resolvable:$true] %s478_s17 }
  0x4c   : > { %s480_s6 = scalar_lea.hbm %s479_s17, 1  ;;  %p483_p8 = scmp.lt.s32.totalorder %s479_s17, %s815_s1 }
  0x4d   : > { %p481_p7 = scmp.ne.s32.totalorder %s479_s17, %s480_s6  ;;  %p484_p9 = scmp.lt.s32.totalorder %s691_s18, %s480_s6 }
  0x4f   : > { %p485_p10 = por %p484_p9, %p483_p8 }
  0x51   : > { %p486_p11 = pnand %p485_p10, %p481_p7 }
  0x53   : > { %489 = shalt.err (!%p486_p11)  }
  0x54   : > { %141 = dma.hbm_to_vmem [thread:$0]  %s137_s0, 16, %s139_s25, [#allocation3 + $0x3] }
  0x55   : > { %s55_s28 = scalar_lea.vmem [#allocation6], %s665_s24  ;;  %s737_s27 = smov 0  }
  0x56 LB: >> { %p148_p12 = scmp.lt.s32.totalorder %s596_s27, 0  ;;  %s149_s30 = ssub.s32 0, %s596_s27  ;;  %s596_s27 = sphi %s737_s27, %s147_s27  }
  0x57   : >> { %s318_s3 = smin.u32 %s596_s27, %s149_s30 }
  0x58   : >> { %s151_s7 = sand.u32 3, %s318_s3  }
  0x59   : >> { %s152_s8 = ssub.s32 0, %s151_s7 }
  0x5a   : >> { %s835_s8 = smov (!%p148_p12, %s152_s8), %s151_s7 }
  0x5b   : >> { %p320_p0 = scmp.lt.s32.totalorder %s835_s8, 0  ;;  %s158_s12 = sadd.s32 4, %s835_s8 }
  0x5d   : >> { %s837_s12 = smov (!%p320_p0, %s158_s12), %s835_s8 }
  0x5e   : >> { %s160_s4 = scalar_lea.vmem [#allocation2], %s837_s12  ;;  %s745_s5 = scalar_lea.sflag [#allocation3], %s837_s12 }
  0x5f   : >> { %576 = dma.done.wait %s745_s5, 16 }
  0x60   : >> { %577 = vsyncadd %s745_s5, 4294967280  ;;  %s169_s25 = sadd.s32 4, %s596_s27  ;;  %v165_v0 = vld [vmem:[%s160_s4] sm:$0x1]  ;;  %s167_s17 = scalar_lea.vmem %s55_s28, %s596_s27 [#allocation6] }
  0x61   : >> { %p750_p1 = scmp.lt.s32.totalorder %s169_s25, 8  ;;  %s174_s29 = sadd.s32 %s661_s23, %s169_s25  ;;  %v166_v1 = vmul.f32 11.313708, %v165_v0 }
  0x62   : >> { %s762_s6 = sshll.u32 %s160_s4, 4  ;;  %s191_s6 = int_to_ptr.vmem [resolvable:$true] %s762_s6 }
  0x63   : >> { %s346_s10 = scalar_select %p750_p1, [#allocation5], [#allocation20]  ;;  %168 = vst [vmem:[%s167_s17] sm:$0x1] %v166_v1 }
  0x64   : >> { %s839_s29 = smov (!%p750_p1, %s174_s29), 0 }
  0x65   : >> { %s175_s0 = sld [smem:[%s346_s10 + %s839_s29]] }
  0x6b   : >> { %p176_p2 = scmp.gt.s32.totalorder %s175_s0, 0  ;;  %p322_p3 = scmp.lt.s32.totalorder %s175_s0, 511 }
  0x6d   : >> { %s841_s0 = smov (!%p176_p2, %s175_s0), 0 }
  0x6e   : >> { %s843_s0 = smov (!%p322_p3, %s841_s0), 511 }
  0x6f   : >> { %s180_s30 = scalar_lea.hbm %s815_s1, %s843_s0 }
  0x70   : >> { %s188_s3 = sshll.u32 %s180_s30, 4  ;;  %s189_s3 = int_to_ptr.hbm [resolvable:$true] %s188_s3 }
  0x71   : >> { %s502_s7 = sshra.s32 %s189_s3, 4  ;;  %s503_s7 = int_to_ptr.hbm [resolvable:$true] %s502_s7 }
  0x72   : >> { %s504_s8 = scalar_lea.hbm %s503_s7, 1  ;;  %p509_p8 = scmp.lt.s32.totalorder %s503_s7, %s815_s1 }
  0x73   : >> { %p505_p5 = scmp.ne.s32.totalorder %s503_s7, %s504_s8  ;;  %p510_p9 = scmp.lt.s32.totalorder %s691_s18, %s504_s8 }
  0x75   : >> { %p506_p13 = pnand %p505_p5, %p750_p1  ;;  %p511_p10 = por %p510_p9, %p509_p8 }
  0x77   : >> { %p507_p7 = pneg %p506_p13 }
  0x79   : >> { %p512_p11 = pnand %p511_p10, %p507_p7 }
  0x7b   : >> { %515 = shalt.err (!%p512_p11)  }
  0x7c   : >> { %s516_s4 = sshra.s32 %s191_s6, 4  ;;  %s603_s10 = smov [#allocation2]   ;;  %s517_s4 = int_to_ptr.vmem [resolvable:$true] %s516_s4 }
  0x7d   : >> { %s518_s29 = scalar_lea.vmem %s517_s4, 1  ;;  %s522_s0 = scalar_lea.vmem %s603_s10, 4 }
  0x7e   : >> { %p519_p12 = scmp.ne.s32.totalorder %s517_s4, %s518_s29  ;;  %p523_p3 = scmp.lt.s32.totalorder %s517_s4, [#allocation2] }
  0x7f   : >> { %p524_p5 = scmp.lt.s32.totalorder %s522_s0, %s518_s29 }
  0x80   : >> { %p520_p0 = pnand %p519_p12, %p750_p1 }
  0x81   : >> { %p525_p13 = por %p524_p5, %p523_p3 }
  0x82   : >> { %p521_p2 = pneg %p520_p0 }
  0x84   : >> { %p526_p6 = pnand %p525_p13, %p521_p2 }
  0x86   : >> { %529 = shalt.err (!%p526_p6)  }
  0x87   : >> { %348 = dma.hbm_to_vmem [thread:$0]  (%p750_p1), %s189_s3, 16, %s191_s6, %s745_s5 }
  0x88   : >> { %s147_s27 = sadd.s32 1, %s596_s27  }
  0x89   : >> { %p144_p7 = scmp.ge.s32.totalorder %s147_s27, 8  }
  0x8a   : > { %s205_s26 = scalar_lea.hbm (%p144_p7), %s816_s2, %s661_s23  ;;  %s207_s30 = sshll.u32 (%p144_p7), %s55_s28, 4  ;;  %s208_s30 = int_to_ptr.vmem [resolvable:$true] %s207_s30 }
  0x8b   : > { %146 = sbr.rel (!%p144_p7) target bundleno = 86 (0x56), region = 92  ;;  %s209_s7 = sshll.u32 (%p144_p7), %s205_s26, 4  ;;  %s210_s7 = int_to_ptr.hbm [resolvable:$true] %s209_s7 }
  0x8c   : > { %s195_s5 = scalar_lea.sflag (%p144_p7), [#allocation7], %s53_s22  ;;  %s544_s11 = sshra.s32 (%p144_p7), %s210_s7, 4  ;;  %s545_s11 = int_to_ptr.hbm [resolvable:$true] %s544_s11 }
  0x8d   : > { %s546_s6 = scalar_lea.hbm (%p144_p7), %s545_s11, 8  ;;  %s550_s3 = scalar_lea.hbm (%p144_p7), %s816_s2, 16 }
  0x8e   : > { %p547_p6 = scmp.ne.s32.totalorder (%p144_p7), %s545_s11, %s546_s6  ;;  %p551_p9 = scmp.lt.s32.totalorder (%p144_p7), %s545_s11, %s816_s2 }
  0x8f   : > { %p552_p10 = scmp.lt.s32.totalorder (%p144_p7), %s550_s3, %s546_s6 }
  0x90   : > { %p548_p1 = pnand %p547_p6, %p650_p4 }
  0x91   : > { %p553_p11 = por %p552_p10, %p551_p9 }
  0x92   : > { %p549_p8 = pneg %p548_p1 }
  0x94   : > { %p554_p12 = pnand %p553_p11, %p549_p8 }
  0x96   : > { %557 = shalt.err (!%p554_p12)
}
  0x97   : > { %349 = dma.vmem_to_hbm [thread:$0]  (%p650_p4), %s208_s30, 128, %s210_s7, %s195_s5  }
  0x98 PF: > { %p356_p0 = scmp.ge.s32.totalorder %s592_s15, 1  ;;  %s221_s22 = sand.u32 1, %s584_s13  }
  0x99   : > { %p820_p2 = scmp.ne.s32.totalorder %s818_s21, 0  ;;  %s222_s24 = scalar_lea.sflag [#allocation7], %s221_s22 }
  0x9b   : > { %p352_p3 = pnand %p356_p0, %p820_p2 }
  0x9d   : > { %p353_p5 = pneg %p352_p3 }
  0x9f   : > { %579 = dma.done.wait (%p353_p5), %s222_s24, 128  }
  0xa0   : > { %581 = vsyncadd (%p353_p5), %s222_s24, 4294967168  ;;  %p20_p13 = scmp.ge.s32.totalorder %s639_s16, 3   ;;  %s821_s13 = smov %s588_s14 }
  0xa1   : > { %s822_s14 = smov %s648_s19  ;;  %s823_s15 = smov %s639_s16 }
  0xa2   :  { %22 = sbr.rel (!%p20_p13) target bundleno = 9 (0x9), region = 103 }
  0xa7   :  { %228 = vsyncpa [#allocation7], 1 }
  0xa8   :  { %230 = vsyncpa [#allocation7 + $0x1], 1 }
  0xa9   :  { %231 = vsyncmov [#allocation3] }
  0xac   :  { %s232_s15 = vpop.sfrf %231 }
  0xad   :  { %p331_p4 = scmp.ne.s32.totalorder %s232_s15, 0 }
  0xaf   :  { %236 = shalt.err (%p331_p4)  }
  0xb0   :  { %238 = vsyncmov [#allocation3 + $0x1] }
  0xb3   :  { %s239_s20 = vpop.sfrf %238 }
  0xb4   :  { %p332_p7 = scmp.ne.s32.totalorder %s239_s20, 0 }
  0xb6   :  { %243 = shalt.err (%p332_p7)  }
  0xb7   :  { %245 = vsyncmov [#allocation3 + $0x2] }
  0xba   :  { %s246_s21 = vpop.sfrf %245 }
  0xbb   :  { %p333_p6 = scmp.ne.s32.totalorder %s246_s21, 0 }
  0xbd   :  { %250 = shalt.err (%p333_p6)  }
  0xbe   :  { %252 = vsyncmov [#allocation3 + $0x3] }
  0xc1   :  { %s253_s28 = vpop.sfrf %252 }
  0xc2   :  { %p334_p1 = scmp.ne.s32.totalorder %s253_s28, 0 }
  0xc4   :  { %257 = shalt.err (%p334_p1)  }

</bundles_post_ra>
